<compile_context>
chip_gen: v7x
topology: tpu7x:2x2x1
jax: 0.10.0
libtpu: 0.0.40
codegen_flags: <defaults>
</compile_context>

<pallas_src>
import functools

import jax
import jax.numpy as jnp
from jax.experimental import pallas as pl
from jax.experimental.pallas import tpu as pltpu


def _round_up(n, m):
    return ((n + m - 1) // m) * m


def mlp_kernel(x_ref, w1_ref, b1_ref, w2_ref, b2_ref, o_ref, h_ref):
    # linear1: [TB, IN] @ [IN, HID] -> f32 accumulation
    h = jnp.dot(x_ref[...], w1_ref[...], preferred_element_type=jnp.float32)
    # bias + ReLU in f32 (v5e VPU has no bf16 path; this is correct everywhere)
    h = jnp.maximum(h + b1_ref[...], 0.0)
    # stage the activation in VMEM scratch (deterministic spill for large TB)
    h_ref[...] = h
    # linear2: [TB, HID] @ [HID, NC_PAD] -> f32 accumulation.
    # Cast to the weight dtype only at the MXU input (no-op for f32 weights;
    # rounds post-ReLU activations to bf16 when bf16 weights are used).
    out = jnp.dot(h_ref[...].astype(w2_ref.dtype), w2_ref[...],
                  preferred_element_type=jnp.float32)
    o_ref[...] = (out + b2_ref[...]).astype(o_ref.dtype)


@functools.partial(jax.jit, static_argnames=("tb", "use_bf16"))
def neural_net_forward(x, w1, b1, w2, b2, *, tb=256, use_bf16=False):
    """Fused Linear -> ReLU -> Linear.

    x : [B, input_size]
    w1: [input_size, hidden_size]   b1: [hidden_size]
    w2: [hidden_size, num_classes]  b2: [num_classes]
    returns [B, num_classes] in float32
    """
    B, in_dim = x.shape
    hid = w1.shape[1]
    nc = w2.shape[1]

    # ---- lane-dense output: pad class dim to a multiple of 128 ----
    nc_pad = _round_up(max(nc, 1), 128)
    if nc_pad != nc:
        w2 = jnp.pad(w2, ((0, 0), (0, nc_pad - nc)))
        b2 = jnp.pad(b2, ((0, nc_pad - nc),))

    # ---- batch tiling: clamp tile to padded batch, pad batch to tile ----
    tb_eff = min(tb, _round_up(B, 8))
    tb_eff = max(8, tb_eff)
    B_pad = _round_up(B, tb_eff)
    if B_pad != B:
        x = jnp.pad(x, ((0, B_pad - B), (0, 0)))

    # ---- optional bf16 MXU inputs (f32 accumulation is kept) ----
    if use_bf16:
        x = x.astype(jnp.bfloat16)
        w1 = w1.astype(jnp.bfloat16)
        w2 = w2.astype(jnp.bfloat16)

    b1_2d = b1.reshape(1, hid).astype(jnp.float32)
    b2_2d = b2.reshape(1, nc_pad).astype(jnp.float32)

    grid = (B_pad // tb_eff,)

    flops = 2 * B_pad * (in_dim * hid + hid * nc_pad)
    bytes_accessed = (
        x.size * x.dtype.itemsize
        + w1.size * w1.dtype.itemsize
        + w2.size * w2.dtype.itemsize
        + b1_2d.size * 4 + b2_2d.size * 4
        + B_pad * nc_pad * 4
    )

    out_full = pl.pallas_call(
        mlp_kernel,
        out_shape=jax.ShapeDtypeStruct((B_pad, nc_pad), jnp.float32),
        grid_spec=pltpu.PrefetchScalarGridSpec(
            num_scalar_prefetch=0,
            grid=grid,
            in_specs=[
                pl.BlockSpec((tb_eff, in_dim), lambda i: (i, 0)),   # x tile
                pl.BlockSpec((in_dim, hid), lambda i: (0, 0)),      # w1 (resident)
                pl.BlockSpec((1, hid), lambda i: (0, 0)),           # b1
                pl.BlockSpec((hid, nc_pad), lambda i: (0, 0)),      # w2 (resident)
                pl.BlockSpec((1, nc_pad), lambda i: (0, 0)),        # b2
            ],
            out_specs=pl.BlockSpec((tb_eff, nc_pad), lambda i: (i, 0)),
            scratch_shapes=[pltpu.VMEM((tb_eff, hid), jnp.float32)],
        ),
        compiler_params=pltpu.CompilerParams(
            dimension_semantics=("parallel",),
        ),
        cost_estimate=pl.CostEstimate(
            flops=flops, transcendentals=0, bytes_accessed=bytes_accessed),
    )(x, w1, b1_2d, w2, b2_2d)

    # slice away batch padding and class padding
    return out_full[:B, :nc]


def init_params(key, input_size, hidden_size, num_classes, dtype=jnp.float32):
    """Deterministic init mimicking torch.nn.Linear (uniform +/- 1/sqrt(fan_in))."""
    k1, k2, k3, k4 = jax.random.split(key, 4)
    bound1 = 1.0 / (input_size ** 0.5)
    bound2 = 1.0 / (hidden_size ** 0.5)
    w1 = jax.random.uniform(k1, (input_size, hidden_size), dtype,
                            minval=-bound1, maxval=bound1)
    b1 = jax.random.uniform(k2, (hidden_size,), dtype,
                            minval=-bound1, maxval=bound1)
    w2 = jax.random.uniform(k3, (hidden_size, num_classes), dtype,
                            minval=-bound2, maxval=bound2)
    b2 = jax.random.uniform(k4, (num_classes,), dtype,
                            minval=-bound2, maxval=bound2)
    return w1, b1, w2, b2


if __name__ == "__main__":
    # Small MNIST-like shapes; batch=20 exercises the batch-padding path and
    # num_classes=10 exercises the lane-dense class padding (10 -> 128).
    batch = 20
    input_size = 256
    hidden_size = 128
    num_classes = 10

    key = jax.random.PRNGKey(0)
    kx, kp = jax.random.split(key)
    x = jax.random.normal(kx, (batch, input_size), dtype=jnp.float32)
    w1, b1, w2, b2 = init_params(kp, input_size, hidden_size, num_classes)

    # Pure-JAX reference (full precision).
    hp = jax.lax.Precision.HIGHEST
    ref = jnp.dot(jnp.maximum(jnp.dot(x, w1, precision=hp) + b1, 0.0),
                  w2, precision=hp) + b2

    # f32 path (tight tolerance).
    out_f32 = neural_net_forward(x, w1, b1, w2, b2, tb=256, use_bf16=False)
    out_f32 = jax.block_until_ready(out_f32)
    assert out_f32.shape == (batch, num_classes)
    assert jnp.allclose(out_f32, ref, atol=1e-3, rtol=1e-3), "f32 mismatch"

    # bf16 MXU-input path (looser tolerance due to bf16 rounding).
    out_bf16 = neural_net_forward(x, w1, b1, w2, b2, tb=256, use_bf16=True)
    out_bf16 = jax.block_until_ready(out_bf16)
    assert out_bf16.shape == (batch, num_classes)
    assert jnp.allclose(out_bf16, ref, atol=5e-2, rtol=5e-2), "bf16 mismatch"

    print("KERNEL_OK")
</pallas_src>

<mosaic_0001>
module attributes {stable_mosaic.version = 11 : i64} {
  func.func @mlp_kernel(%arg0: i32, %arg1: memref<24x256xf32, #tpu.memory_space<vmem>>, %arg2: memref<256x128xf32, #tpu.memory_space<vmem>>, %arg3: memref<1x128xf32, #tpu.memory_space<vmem>>, %arg4: memref<128x128xf32, #tpu.memory_space<vmem>>, %arg5: memref<1x128xf32, #tpu.memory_space<vmem>>, %arg6: memref<24x128xf32, #tpu.memory_space<vmem>>, %arg7: memref<24x128xf32, #tpu.memory_space<vmem>>) attributes {dimension_semantics = [#tpu.dimension_semantics<parallel>], iteration_bounds = array<i64: 1>, scalar_prefetch = 0 : i64, scratch_operands = 1 : i64, tpu.core_type = #tpu.core_type<tc>, window_params = [{transform_indices = @transform_0, window_bounds = array<i64: 24, 256>}, {pipeline_mode = #tpu.pipeline_mode<synchronous>, transform_indices = @transform_1, window_bounds = array<i64: 256, 128>}, {pipeline_mode = #tpu.pipeline_mode<synchronous>, transform_indices = @transform_2, window_bounds = array<i64: 1, 128>}, {pipeline_mode = #tpu.pipeline_mode<synchronous>, transform_indices = @transform_3, window_bounds = array<i64: 128, 128>}, {pipeline_mode = #tpu.pipeline_mode<synchronous>, transform_indices = @transform_4, window_bounds = array<i64: 1, 128>}, {transform_indices = @transform_5, window_bounds = array<i64: 24, 128>}]} {
    %c0 = arith.constant 0 : index
    %c0_0 = arith.constant 0 : index
    %0 = vector.load %arg1[%c0, %c0_0] : memref<24x256xf32, #tpu.memory_space<vmem>>, vector<24x256xf32>
    %c0_1 = arith.constant 0 : index
    %c0_2 = arith.constant 0 : index
    %1 = vector.load %arg2[%c0_1, %c0_2] : memref<256x128xf32, #tpu.memory_space<vmem>>, vector<256x128xf32>
    %cst = arith.constant dense<0.000000e+00> : vector<24x128xf32>
    %2 = tpu.matmul %0, %1, %cst {dimension_numbers = #tpu.dot_dimension_numbers<[1], [0], [0], [1], [0, 0, 1, 1], [], []>} : vector<24x256xf32>, vector<256x128xf32>, vector<24x128xf32> -> vector<24x128xf32>
    %c0_3 = arith.constant 0 : index
    %c0_4 = arith.constant 0 : index
    %3 = vector.load %arg3[%c0_3, %c0_4] : memref<1x128xf32, #tpu.memory_space<vmem>>, vector<1x128xf32>
    %4 = vector.broadcast %3 : vector<1x128xf32> to vector<24x128xf32>
    %5 = arith.addf %2, %4 : vector<24x128xf32>
    %cst_5 = arith.constant 0.000000e+00 : f32
    %6 = vector.broadcast %cst_5 : f32 to vector<24x128xf32>
    %7 = arith.maximumf %5, %6 : vector<24x128xf32>
    %c0_6 = arith.constant 0 : index
    %c0_7 = arith.constant 0 : index
    %8 = vector.load %arg7[%c0_6, %c0_7] : memref<24x128xf32, #tpu.memory_space<vmem>>, vector<24x128xf32>
    tpu.vector_store %arg7[%c0_6, %c0_7], %7 {strides = array<i32>} : memref<24x128xf32, #tpu.memory_space<vmem>>, vector<24x128xf32>,
    %c0_8 = arith.constant 0 : index
    %c0_9 = arith.constant 0 : index
    %9 = vector.load %arg7[%c0_8, %c0_9] : memref<24x128xf32, #tpu.memory_space<vmem>>, vector<24x128xf32>
    %c0_10 = arith.constant 0 : index
    %c0_11 = arith.constant 0 : index
    %10 = vector.load %arg4[%c0_10, %c0_11] : memref<128x128xf32, #tpu.memory_space<vmem>>, vector<128x128xf32>
    %cst_12 = arith.constant dense<0.000000e+00> : vector<24x128xf32>
    %11 = tpu.matmul %9, %10, %cst_12 {dimension_numbers = #tpu.dot_dimension_numbers<[1], [0], [0], [1], [0, 0, 1, 1], [], []>} : vector<24x128xf32>, vector<128x128xf32>, vector<24x128xf32> -> vector<24x128xf32>
    %c0_13 = arith.constant 0 : index
    %c0_14 = arith.constant 0 : index
    %12 = vector.load %arg5[%c0_13, %c0_14] : memref<1x128xf32, #tpu.memory_space<vmem>>, vector<1x128xf32>
    %13 = vector.broadcast %12 : vector<1x128xf32> to vector<24x128xf32>
    %14 = arith.addf %11, %13 : vector<24x128xf32>
    %c0_15 = arith.constant 0 : index
    %c0_16 = arith.constant 0 : index
    %15 = vector.load %arg6[%c0_15, %c0_16] : memref<24x128xf32, #tpu.memory_space<vmem>>, vector<24x128xf32>
    tpu.vector_store %arg6[%c0_15, %c0_16], %14 {strides = array<i32>} : memref<24x128xf32, #tpu.memory_space<vmem>>, vector<24x128xf32>,
    return
  }
  func.func @transform_0(%arg0: i32) -> (i32, i32) {
    %c0_i32 = arith.constant 0 : i32
    %c0_i32_0 = arith.constant 0 : i32
    return %arg0, %c0_i32 : i32, i32
  }
  func.func @transform_1(%arg0: i32) -> (i32, i32) {
    %c0_i32 = arith.constant 0 : i32
    %c0_i32_0 = arith.constant 0 : i32
    %c0_i32_1 = arith.constant 0 : i32
    return %c0_i32, %c0_i32_0 : i32, i32
  }
  func.func @transform_2(%arg0: i32) -> (i32, i32) {
    %c0_i32 = arith.constant 0 : i32
    %c0_i32_0 = arith.constant 0 : i32
    %c0_i32_1 = arith.constant 0 : i32
    return %c0_i32, %c0_i32_0 : i32, i32
  }
  func.func @transform_3(%arg0: i32) -> (i32, i32) {
    %c0_i32 = arith.constant 0 : i32
    %c0_i32_0 = arith.constant 0 : i32
    %c0_i32_1 = arith.constant 0 : i32
    return %c0_i32, %c0_i32_0 : i32, i32
  }
  func.func @transform_4(%arg0: i32) -> (i32, i32) {
    %c0_i32 = arith.constant 0 : i32
    %c0_i32_0 = arith.constant 0 : i32
    %c0_i32_1 = arith.constant 0 : i32
    return %c0_i32, %c0_i32_0 : i32, i32
  }
  func.func @transform_5(%arg0: i32) -> (i32, i32) {
    %c0_i32 = arith.constant 0 : i32
    %c0_i32_0 = arith.constant 0 : i32
    return %arg0, %c0_i32 : i32, i32
  }
}

</mosaic_0001>

<bundles_post_ra>
// kernel: neural_net_forward.1
= control target key start
LH: loop header
LB: loop body
LE: loop exit
PB: predicated region body
PF: predicated region fallthrough
CT: control target
= control target key end

     0   :  { %v426_v3 = vmov 0.0|0.0   ;;  %vm427_vm0 = vmmov 0   ;;  %s647_s1 = inlined_call_operand.vmem [shape: f32[256,128], index: 1, kind: input, shape index: {}]   ;;  %s648_s0 = inlined_call_operand.vmem [shape: f32[24,256], index: 0, kind: input, shape index: {}]   ;;  %s649_s3 = inlined_call_operand.vmem [shape: f32[128,128], index: 3, kind: input, shape index: {}]   ;;  %s650_s2 = inlined_call_operand.vmem [shape: f32[1,128], index: 2, kind: input, shape index: {}]   ;;  %s651_s4 = inlined_call_operand.vmem [shape: f32[1,128], index: 4, kind: input, shape index: {}]   ;;  %s652_s5 = inlined_call_operand.vmem [shape: f32[24,128], index: 5, kind: output, shape index: {}]  }
   0x1   :  { %v42_v0 = vld [vmem:[%s647_s1 + $0x80] sm:$0xff]  ;;  %v43_v1 = vld [vmem:[%s647_s1 + $0x88] sm:$0xff]  ;;  %399 = vmatprep.subr.bf16.mxu1 %v426_v3  ;;  %v44_v6 = vld [vmem:[%s647_s1 + $0x90] sm:$0xff] }
   0x2   :  { %v26_v2 = vld [vmem:[%s647_s1] sm:$0xff]  ;;  %v367_v4 = vpack.c.bf16 %v43_v1, %v42_v0  ;;  %v27_v5 = vld [vmem:[%s647_s1 + $0x8] sm:$0xff]  ;;  %v45_v7 = vld [vmem:[%s647_s1 + $0x98] sm:$0xff] }
   0x3   :  { %v369_v8 = vpack.c.bf16 %v27_v5, %v26_v2  ;;  %v371_v9 = vpack.c.bf16 %v45_v7, %v44_v6  ;;  %v28_v10 = vld [vmem:[%s647_s1 + $0x10] sm:$0xff]  ;;  %v29_v11 = vld [vmem:[%s647_s1 + $0x18] sm:$0xff]  ;;  %v46_v12 = vld [vmem:[%s647_s1 + $0xa0] sm:$0xff] }
   0x4   :  { %368 = vmatprep.subr.bf16.mxu0 %v367_v4  ;;  %v47_v13 = vld [vmem:[%s647_s1 + $0xa8] sm:$0xff]  ;;  %v373_v14 = vpack.c.bf16 %v29_v11, %v28_v10  ;;  %v30_v16 = vld [vmem:[%s647_s1 + $0x20] sm:$0xff]  ;;  %v48_v18 = vld [vmem:[%s647_s1 + $0xb0] sm:$0xff] }
   0x5   :  { %370 = vmatpush3.bf16.msra.mxu0 %v369_v8  ;;  %v375_v15 = vpack.c.bf16 %v47_v13, %v46_v12  ;;  %v31_v17 = vld [vmem:[%s647_s1 + $0x28] sm:$0xff]  ;;  %v49_v19 = vld [vmem:[%s647_s1 + $0xb8] sm:$0xff]  ;;  %v32_v22 = vld [vmem:[%s647_s1 + $0x30] sm:$0xff] }
   0x6   :  { %372 = vmatprep.subr.bf16.mxu0 %v371_v9  ;;  %v377_v20 = vpack.c.bf16 %v31_v17, %v30_v16  ;;  %v379_v21 = vpack.c.bf16 %v49_v19, %v48_v18  ;;  %v33_v23 = vld [vmem:[%s647_s1 + $0x38] sm:$0xff]  ;;  %v50_v24 = vld [vmem:[%s647_s1 + $0xc0] sm:$0xff]  ;;  %v51_v25 = vld [vmem:[%s647_s1 + $0xc8] sm:$0xff]  ;;  %v428_v16 = vmov 0.0  }
   0x7   :  { %v21_v26 = vld [vmem:[%s648_s0 + $0x8] sm:$0xff]  ;;  %v381_v27 = vpack.c.bf16 %v33_v23, %v32_v22  ;;  %v34_v28 = vld [vmem:[%s647_s1 + $0x40] sm:$0xff]  ;;  %v383_v31 = vpack.c.bf16 %v51_v25, %v50_v24  ;;  %v156_v33 = vld [vmem:[%s649_s3 + $0x10] sm:$0xff]  ;;  %358 = vmatprep.mubr.msk.f32.mxu1 %vm427_vm0, %v428_v16 }
   0x8   :  { %129 = vmatprep.mubr.f32.mxu0 %v21_v26  ;;  %v35_v29 = vld [vmem:[%s647_s1 + $0x48] sm:$0xff]  ;;  %v154_v30 = vld [vmem:[%s649_s3] sm:$0xff]  ;;  %v157_v34 = vld [vmem:[%s649_s3 + $0x18] sm:$0xff] }
   0x9   :  { %374 = vmatpush3.bf16.msra.mxu0 %v373_v14  ;;  %v155_v32 = vld [vmem:[%s649_s3 + $0x8] sm:$0xff]  ;;  %v52_v35 = vld [vmem:[%s647_s1 + $0xd0] sm:$0xff]  ;;  %v53_v36 = vld [vmem:[%s647_s1 + $0xd8] sm:$0xff]  ;;  %v385_v38 = vpack.c.bf16 %v35_v29, %v34_v28  ;;  %v403_v40 = vpack.c.bf16 %v157_v34, %v156_v33 }
   0xa   :  { %376 = vmatprep.subr.bf16.mxu0 %v375_v15  ;;  %v400_v37 = vpack.c.bf16 %v155_v32, %v154_v30  ;;  %v36_v39 = vld [vmem:[%s647_s1 + $0x50] sm:$0xff]  ;;  %v387_v41 = vpack.c.bf16 %v53_v36, %v52_v35  ;;  %v37_v42 = vld [vmem:[%s647_s1 + $0x58] sm:$0xff]  ;;  %v158_v43 = vld [vmem:[%s649_s3 + $0x20] sm:$0xff] }
   0xb   :  { %v159_v44 = vld [vmem:[%s649_s3 + $0x28] sm:$0xff]  ;;  %v54_v45 = vld [vmem:[%s647_s1 + $0xe0] sm:$0xff]  ;;  %v389_v47 = vpack.c.bf16 %v37_v42, %v36_v39  ;;  %v160_v52 = vld [vmem:[%s649_s3 + $0x30] sm:$0xff] }
   0xc   :  { %401 = vmatpush3.bf16.msra.mxu1 %v400_v37  ;;  %v55_v46 = vld [vmem:[%s647_s1 + $0xe8] sm:$0xff]  ;;  %v38_v48 = vld [vmem:[%s647_s1 + $0x60] sm:$0xff]  ;;  %v406_v49 = vpack.c.bf16 %v159_v44, %v158_v43  ;;  %v161_v53 = vld [vmem:[%s649_s3 + $0x38] sm:$0xff] }
   0xd   :  { %378 = vmatpush3.bf16.msra.mxu0 %v377_v20  ;;  %402 = vmatprep.subr.bf16.mxu1 %v426_v3  ;;  %v391_v50 = vpack.c.bf16 %v55_v46, %v54_v45  ;;  %v39_v51 = vld [vmem:[%s647_s1 + $0x68] sm:$0xff]  ;;  %v56_v54 = vld [vmem:[%s647_s1 + $0xf0] sm:$0xff]  ;;  %v57_v55 = vld [vmem:[%s647_s1 + $0xf8] sm:$0xff]  ;;  %v409_v58 = vpack.c.bf16 %v161_v53, %v160_v52 }
   0xe   :  { %380 = vmatprep.subr.bf16.mxu0 %v379_v21  ;;  %v393_v56 = vpack.c.bf16 %v39_v51, %v38_v48  ;;  %v40_v57 = vld [vmem:[%s647_s1 + $0x70] sm:$0xff]  ;;  %v395_v59 = vpack.c.bf16 %v57_v55, %v56_v54  ;;  %v41_v60 = vld [vmem:[%s647_s1 + $0x78] sm:$0xff]  ;;  %v162_v61 = vld [vmem:[%s649_s3 + $0x40] sm:$0xff] }
   0xf   :  { %v163_v62 = vld [vmem:[%s649_s3 + $0x48] sm:$0xff]  ;;  %v397_v63 = vpack.c.bf16 %v41_v60, %v40_v57  ;;  %v164_v1 = vld [vmem:[%s649_s3 + $0x50] sm:$0xff]  ;;  %v165_v2 = vld [vmem:[%s649_s3 + $0x58] sm:$0xff] }
  0x10   :  { %404 = vmatpush3.bf16.msra.mxu1 %v403_v40  ;;  %v412_v0 = vpack.c.bf16 %v163_v62, %v162_v61  ;;  %v20_v4 = vld [vmem:[%s648_s0] sm:$0xff]  ;;  %v415_v5 = vpack.c.bf16 %v165_v2, %v164_v1  ;;  %v23_v6 = vld [vmem:[%s648_s0 + $0x18] sm:$0xff]  ;;  %v22_v7 = vld [vmem:[%s648_s0 + $0x10] sm:$0xff] }
  0x11   :  { %382 = vmatpush3.bf16.msra.mxu0 %v381_v27  ;;  %405 = vmatprep.subr.bf16.mxu1 %v426_v3  ;;  %v25_v8 = vld [vmem:[%s648_s0 + $0x28] sm:$0xff]  ;;  %v24_v9 = vld [vmem:[%s648_s0 + $0x20] sm:$0xff]  ;;  %v168_v13 = vld [vmem:[%s649_s3 + $0x70] sm:$0xff] }
  0x12   :  { %384 = vmatprep.subr.bf16.mxu0 %v383_v31  ;;  %v166_v10 = vld [vmem:[%s649_s3 + $0x60] sm:$0xff]  ;;  %v167_v11 = vld [vmem:[%s649_s3 + $0x68] sm:$0xff]  ;;  %v169_v14 = vld [vmem:[%s649_s3 + $0x78] sm:$0xff] }
  0x13   :  { %v418_v12 = vpack.c.bf16 %v167_v11, %v166_v10  ;;  %v421_v15 = vpack.c.bf16 %v169_v14, %v168_v13  ;;  %v264_v18 = vld [vmem:[%s650_s2] ss:$0 sm:$0xff] }
  0x14   :  { %407 = vmatpush3.bf16.msra.mxu1 %v406_v49  ;;  %v265_v32 = vld [vmem:[%s651_s4] ss:$0 sm:$0xff] }
  0x15   :  { %386 = vmatpush3.bf16.msra.mxu0 %v385_v38  ;;  %408 = vmatprep.subr.bf16.mxu1 %v426_v3 }
  0x16   :  { %388 = vmatprep.subr.bf16.mxu0 %v387_v41 }
  0x18   :  { %410 = vmatpush3.bf16.msra.mxu1 %v409_v58 }
  0x19   :  { %390 = vmatpush3.bf16.msra.mxu0 %v389_v47  ;;  %411 = vmatprep.subr.bf16.mxu1 %v426_v3 }
  0x1a   :  { %392 = vmatprep.subr.bf16.mxu0 %v391_v50 }
  0x1c   :  { %413 = vmatpush3.bf16.msra.mxu1 %v412_v0 }
  0x1d   :  { %394 = vmatpush3.bf16.msra.mxu0 %v393_v56  ;;  %414 = vmatprep.subr.bf16.mxu1 %v426_v3 }
  0x1e   :  { %396 = vmatprep.subr.bf16.mxu0 %v395_v59 }
  0x20   :  { %416 = vmatpush3.bf16.msra.mxu1 %v415_v5 }
  0x21   :  { %398 = vmatpush3.bf16.msra.mxu0 %v397_v63  ;;  %417 = vmatprep.subr.bf16.mxu1 %v426_v3 }
  0x24   :  { %130 = vmatmul.mubr.f32.vlgmr.msra.gmra.mrb[0].mxu0 %v20_v4  ;;  %419 = vmatpush3.bf16.msra.mxu1 %v418_v12 }
  0x25   :  { %134 = vmatprep.mubr.f32.mxu0 %v23_v6  ;;  %420 = vmatprep.subr.bf16.mxu1 %v426_v3 }
  0x28   :  { %135 = vmatmul.mubr.f32.gmra.mrb[2].mxu0 %v22_v7  ;;  %422 = vmatpush3.bf16.msra.mxu1 %v421_v15 }
  0x29   :  { %139 = vmatprep.mubr.f32.mxu0 %v25_v8 }
  0x2c   :  { %140 = vmatmul.mubr.f32.gmra.mrb[4].mxu0 %v24_v9 }
  0xf7   :  { %v298_v17 = vpop.f32.mrb[0].mxu0 }
  0xf8   :  { %v299_v3 = vpop.f32.mrb[1].mxu0 }
  0xf9   :  { %v300_v19 = vadd.f32 %v299_v3, %v298_v17 }
  0xfb   :  { %v132_v20 = vadd.f32 %v300_v19, %v264_v18  ;;  %v301_v21 = vpop.f32.mrb[2].mxu0 }
  0xfc   :  { %v302_v22 = vpop.f32.mrb[3].mxu0 }
  0xfd   :  { %v145_v23 = vmax.f32 %v132_v20, 0.0  ;;  %v303_v24 = vadd.f32 %v302_v22, %v301_v21 }
  0xff   :  { %v137_v25 = vadd.f32 %v303_v24, %v264_v18  ;;  %v304_v26 = vpop.f32.mrb[4].mxu0  ;;  %359 = vmatmul.mubr.f32.vlgmr.msra.gmra.mrb[0].mxu1 %v145_v23 }
 0x100   :  { %v305_v27 = vpop.f32.mrb[5].mxu0  ;;  %361 = vmatprep.mubr.msk.f32.mxu1 %vm427_vm0, %v428_v16 }
 0x101   :  { %v146_v28 = vmax.f32 %v137_v25, 0.0  ;;  %v306_v29 = vadd.f32 %v305_v27, %v304_v26 }
 0x103   :  { %v142_v30 = vadd.f32 %v306_v29, %v264_v18  ;;  %362 = vmatmul.mubr.f32.gmra.mrb[2].mxu1 %v146_v28 }
 0x104   :  { %364 = vmatprep.mubr.msk.f32.mxu1 %vm427_vm0, %v428_v16 }
 0x105   :  { %v147_v31 = vmax.f32 %v142_v30, 0.0 }
 0x107   :  { %365 = vmatmul.mubr.f32.gmra.mrb[4].mxu1 %v147_v31 }
 0x1d2   :  { %v243_v33 = vpop.f32.mrb[0].mxu1 }
 0x1d3   :  { %v244_v34 = vadd.f32 %v265_v32, %v243_v33  ;;  %v360_v35 = vpop.f32.mrb[1].mxu1 }
 0x1d5   :  { %257 = vst [vmem:[%s652_s5] sm:$0xff] %v244_v34 }
 0x1d6   :  { %v248_v36 = vpop.f32.mrb[2].mxu1 }
 0x1d7   :  { %v249_v37 = vadd.f32 %v265_v32, %v248_v36  ;;  %v363_v38 = vpop.f32.mrb[3].mxu1 }
 0x1d9   :  { %258 = vst [vmem:[%s652_s5 + $0x8] sm:$0xff] %v249_v37 }
 0x1da   :  { %v253_v39 = vpop.f32.mrb[4].mxu1 }
 0x1db   :  { %v254_v40 = vadd.f32 %v265_v32, %v253_v39  ;;  %v366_v41 = vpop.f32.mrb[5].mxu1 }
 0x1dd   :  { %259 = vst [vmem:[%s652_s5 + $0x10] sm:$0xff] %v254_v40 }

</bundles_post_ra>
